<compile_context>
chip_gen: v7x
topology: tpu7x:2x2x1
jax: 0.10.0
libtpu: 0.0.40
codegen_flags: <defaults>
</compile_context>

<pallas_src>
import jax
import jax.numpy as jnp
from jax.experimental import pallas as pl
from jax.experimental.pallas import tpu as pltpu

EPS = 1e-5


def imgnn_kernel(x_ref, scale_ref, shift_ref, w_ref, b_ref, o_ref):
    """One grid step = one (tile_m, tile_n) output tile.

    x_ref:     (tile_m, D_in)   input rows for this batch tile (f32)
    scale_ref: (1, D_in)        folded BN scale  = gamma * rsqrt(var + eps)
    shift_ref: (1, D_in)        folded BN shift  = beta - mean * scale
    w_ref:     (D_in, tile_n)   linear weight tile (pre-transposed, bf16)
    b_ref:     (1, tile_n)      linear bias tile (f32)
    o_ref:     (tile_m, tile_n) output tile
    """
    # BN as a fused scale/shift (f32 on the VPU), then bf16 MXU matmul with
    # f32 accumulation, bias add and ReLU.
    xn = x_ref[...].astype(jnp.float32) * scale_ref[...] + shift_ref[...]
    out = jnp.dot(xn.astype(w_ref.dtype), w_ref[...],
                  preferred_element_type=jnp.float32)
    out = out + b_ref[...]
    o_ref[...] = jnp.maximum(out, 0.0).astype(o_ref.dtype)


def prepare_linear_params(weight, bias, mxu_dtype=jnp.bfloat16):
    """One-time param prep: (D_out, D_in) -> (D_in, D_out) transpose + cast."""
    w_t = jnp.asarray(weight).T.astype(mxu_dtype)
    b = jnp.asarray(bias, dtype=jnp.float32)
    return w_t, b


def _pick_tile(dim, candidates):
    for c in candidates:
        if dim % c == 0:
            return c
    return dim  # fall back to the full (untiled) dimension — always legal


@jax.jit
def imgnn_forward(x, gamma, beta, w_t, bias):
    """x: (N, D_in) f32; gamma/beta: (D_in,); w_t: (D_in, D_out) bf16; bias: (D_out,)."""
    n, d_in = x.shape
    d_out = w_t.shape[1]

    # Tile selection (shapes are static under jit).  Blocks must be
    # (8, 128)-aligned on the last two dims or span the full array dim.
    tile_n = _pick_tile(d_out, (256, 128))
    tile_m = _pick_tile(n, (256, 128, 64, 32, 16, 8))

    # --- BatchNorm1d (training-mode) stats, folded to scale/shift (XLA) ---
    xf = x.astype(jnp.float32)
    mean = jnp.mean(xf, axis=0)                                 # (D_in,)
    var = jnp.mean(jnp.square(xf - mean[None, :]), axis=0)      # biased var
    inv = jax.lax.rsqrt(var + EPS)
    scale_v = gamma.astype(jnp.float32) * inv                   # (D_in,)
    shift_v = beta.astype(jnp.float32) - mean * scale_v         # (D_in,)
    scale = scale_v.reshape(1, d_in)
    shift = shift_v.reshape(1, d_in)
    bias2 = bias.astype(jnp.float32).reshape(1, d_out)

    grid = (n // tile_m, d_out // tile_n)

    cost = pl.CostEstimate(
        flops=2 * n * d_in * d_out + 2 * n * d_in,
        transcendentals=0,
        bytes_accessed=(n * d_in * 4            # x (read once: batch-outer grid)
                        + d_in * d_out * 2      # bf16 weight (per batch tile; lower bound)
                        + d_out * 4 + 2 * d_in * 4
                        + n * d_out * 4),       # output
    )

    return pl.pallas_call(
        imgnn_kernel,
        out_shape=jax.ShapeDtypeStruct((n, d_out), x.dtype),
        grid_spec=pltpu.PrefetchScalarGridSpec(
            num_scalar_prefetch=0,
            grid=grid,
            in_specs=[
                pl.BlockSpec((tile_m, d_in), lambda i, j: (i, 0)),   # x rows (const over j)
                pl.BlockSpec((1, d_in), lambda i, j: (0, 0)),        # BN scale
                pl.BlockSpec((1, d_in), lambda i, j: (0, 0)),        # BN shift
                pl.BlockSpec((d_in, tile_n), lambda i, j: (0, j)),   # W^T tile (streams)
                pl.BlockSpec((1, tile_n), lambda i, j: (0, j)),      # bias tile
            ],
            out_specs=pl.BlockSpec((tile_m, tile_n), lambda i, j: (i, j)),
        ),
        compiler_params=pltpu.CompilerParams(
            # No cross-step dependency -> both axes parallel (sharded across
            # the two TensorCores on v7x, neutral on v5e/v6e).
            dimension_semantics=("parallel", "parallel"),
        ),
        cost_estimate=cost,
    )(x, scale, shift, w_t, bias2)


def imgnn_reference_f32(x, gamma, beta, weight, bias):
    """Pure-JAX f32 reference matching PyTorch training-mode forward."""
    xf = x.astype(jnp.float32)
    mean = jnp.mean(xf, axis=0, keepdims=True)
    var = jnp.mean((xf - mean) ** 2, axis=0, keepdims=True)
    xn = (xf - mean) * jax.lax.rsqrt(var + EPS) * gamma + beta
    out = xn @ weight.T + bias
    return jnp.maximum(out, 0.0)


def imgnn_reference_bf16(x, gamma, beta, w_t_bf16, bias):
    """Reference with the same folded scale/shift + bf16 matmul as the kernel."""
    xf = x.astype(jnp.float32)
    mean = jnp.mean(xf, axis=0)
    var = jnp.mean(jnp.square(xf - mean[None, :]), axis=0)
    inv = jax.lax.rsqrt(var + EPS)
    scale = gamma * inv
    shift = beta - mean * scale
    xn = xf * scale[None, :] + shift[None, :]
    out = jnp.dot(xn.astype(w_t_bf16.dtype), w_t_bf16,
                  preferred_element_type=jnp.float32) + bias
    return jnp.maximum(out, 0.0)


if __name__ == "__main__":
    # Small shapes consistent with the module (input_dim -> output_dim Linear);
    # module defaults are 4096 -> 1024, scaled down for the demo.
    N, D_IN, D_OUT = 16, 512, 256

    key = jax.random.PRNGKey(0)
    kx, kw, kb, kg, kbt = jax.random.split(key, 5)

    x = jax.random.normal(kx, (N, D_IN), dtype=jnp.float32)

    # BatchNorm1d affine params (non-trivial values for a stricter check).
    gamma = 1.0 + 0.1 * jax.random.normal(kg, (D_IN,), dtype=jnp.float32)
    beta = 0.1 * jax.random.normal(kbt, (D_IN,), dtype=jnp.float32)

    # Linear params: uniform(-1/sqrt(fan_in), 1/sqrt(fan_in)) like PyTorch.
    bound = 1.0 / (D_IN ** 0.5)
    weight = jax.random.uniform(kw, (D_OUT, D_IN), minval=-bound, maxval=bound,
                                dtype=jnp.float32)
    bias = jax.random.uniform(kb, (D_OUT,), minval=-bound, maxval=bound,
                              dtype=jnp.float32)

    # One-time param prep (transpose + bf16 cast), outside the jitted forward.
    w_t, bias_p = prepare_linear_params(weight, bias)

    out = imgnn_forward(x, gamma, beta, w_t, bias_p)
    out = jax.block_until_ready(out)
    assert out.shape == (N, D_OUT), out.shape

    # Tight check vs. a reference using the same folded-BN + bf16 matmul path.
    ref_bf16 = imgnn_reference_bf16(x, gamma, beta, w_t, bias)
    assert jnp.allclose(out, ref_bf16, atol=5e-3, rtol=5e-3), \
        float(jnp.max(jnp.abs(out - ref_bf16)))

    # Loose check vs. the full-f32 PyTorch-equivalent forward (bf16 MXU inputs
    # introduce ~1e-3-level quantization error, well inside this tolerance).
    ref_f32 = imgnn_reference_f32(x, gamma, beta, weight, bias)
    assert jnp.allclose(out, ref_f32, atol=3e-2, rtol=3e-2), \
        float(jnp.max(jnp.abs(out - ref_f32)))

    print("KERNEL_OK")
</pallas_src>

<mosaic_0001>
module attributes {stable_mosaic.version = 11 : i64} {
  func.func @imgnn_kernel(%arg0: i32, %arg1: i32, %arg2: memref<16x512xf32, #tpu.memory_space<vmem>>, %arg3: memref<1x512xf32, #tpu.memory_space<vmem>>, %arg4: memref<1x512xf32, #tpu.memory_space<vmem>>, %arg5: memref<512x256xbf16, #tpu.memory_space<vmem>>, %arg6: memref<1x256xf32, #tpu.memory_space<vmem>>, %arg7: memref<16x256xf32, #tpu.memory_space<vmem>>) attributes {dimension_semantics = [#tpu.dimension_semantics<parallel>, #tpu.dimension_semantics<parallel>], iteration_bounds = array<i64: 1, 1>, scalar_prefetch = 0 : i64, scratch_operands = 0 : i64, tpu.core_type = #tpu.core_type<tc>, window_params = [{transform_indices = @transform_0, window_bounds = array<i64: 16, 512>}, {pipeline_mode = #tpu.pipeline_mode<synchronous>, transform_indices = @transform_1, window_bounds = array<i64: 1, 512>}, {pipeline_mode = #tpu.pipeline_mode<synchronous>, transform_indices = @transform_2, window_bounds = array<i64: 1, 512>}, {transform_indices = @transform_3, window_bounds = array<i64: 512, 256>}, {transform_indices = @transform_4, window_bounds = array<i64: 1, 256>}, {transform_indices = @transform_5, window_bounds = array<i64: 16, 256>}]} {
    %c0 = arith.constant 0 : index
    %c0_0 = arith.constant 0 : index
    %0 = vector.load %arg2[%c0, %c0_0] : memref<16x512xf32, #tpu.memory_space<vmem>>, vector<16x512xf32>
    %c0_1 = arith.constant 0 : index
    %c0_2 = arith.constant 0 : index
    %1 = vector.load %arg3[%c0_1, %c0_2] : memref<1x512xf32, #tpu.memory_space<vmem>>, vector<1x512xf32>
    %2 = vector.broadcast %1 : vector<1x512xf32> to vector<16x512xf32>
    %3 = arith.mulf %0, %2 : vector<16x512xf32>
    %c0_3 = arith.constant 0 : index
    %c0_4 = arith.constant 0 : index
    %4 = vector.load %arg4[%c0_3, %c0_4] : memref<1x512xf32, #tpu.memory_space<vmem>>, vector<1x512xf32>
    %5 = vector.broadcast %4 : vector<1x512xf32> to vector<16x512xf32>
    %6 = arith.addf %3, %5 : vector<16x512xf32>
    %7 = arith.truncf %6 : vector<16x512xf32> to vector<16x512xbf16>
    %c0_5 = arith.constant 0 : index
    %c0_6 = arith.constant 0 : index
    %8 = vector.load %arg5[%c0_5, %c0_6] : memref<512x256xbf16, #tpu.memory_space<vmem>>, vector<512x256xbf16>
    %cst = arith.constant dense<0.000000e+00> : vector<16x256xf32>
    %9 = tpu.matmul %7, %8, %cst {dimension_numbers = #tpu.dot_dimension_numbers<[1], [0], [0], [1], [0, 0, 1, 1], [], []>} : vector<16x512xbf16>, vector<512x256xbf16>, vector<16x256xf32> -> vector<16x256xf32>
    %c0_7 = arith.constant 0 : index
    %c0_8 = arith.constant 0 : index
    %10 = vector.load %arg6[%c0_7, %c0_8] : memref<1x256xf32, #tpu.memory_space<vmem>>, vector<1x256xf32>
    %11 = vector.broadcast %10 : vector<1x256xf32> to vector<16x256xf32>
    %12 = arith.addf %9, %11 : vector<16x256xf32>
    %cst_9 = arith.constant 0.000000e+00 : f32
    %13 = vector.broadcast %cst_9 : f32 to vector<16x256xf32>
    %14 = arith.maximumf %12, %13 : vector<16x256xf32>
    %c0_10 = arith.constant 0 : index
    %c0_11 = arith.constant 0 : index
    %15 = vector.load %arg7[%c0_10, %c0_11] : memref<16x256xf32, #tpu.memory_space<vmem>>, vector<16x256xf32>
    tpu.vector_store %arg7[%c0_10, %c0_11], %14 {strides = array<i32>} : memref<16x256xf32, #tpu.memory_space<vmem>>, vector<16x256xf32>,
    return
  }
  func.func @transform_0(%arg0: i32, %arg1: i32) -> (i32, i32) {
    %c0_i32 = arith.constant 0 : i32
    %c0_i32_0 = arith.constant 0 : i32
    return %arg0, %c0_i32 : i32, i32
  }
  func.func @transform_1(%arg0: i32, %arg1: i32) -> (i32, i32) {
    %c0_i32 = arith.constant 0 : i32
    %c0_i32_0 = arith.constant 0 : i32
    %c0_i32_1 = arith.constant 0 : i32
    return %c0_i32, %c0_i32_0 : i32, i32
  }
  func.func @transform_2(%arg0: i32, %arg1: i32) -> (i32, i32) {
    %c0_i32 = arith.constant 0 : i32
    %c0_i32_0 = arith.constant 0 : i32
    %c0_i32_1 = arith.constant 0 : i32
    return %c0_i32, %c0_i32_0 : i32, i32
  }
  func.func @transform_3(%arg0: i32, %arg1: i32) -> (i32, i32) {
    %c0_i32 = arith.constant 0 : i32
    %c0_i32_0 = arith.constant 0 : i32
    return %c0_i32, %arg1 : i32, i32
  }
  func.func @transform_4(%arg0: i32, %arg1: i32) -> (i32, i32) {
    %c0_i32 = arith.constant 0 : i32
    %c0_i32_0 = arith.constant 0 : i32
    return %c0_i32, %arg1 : i32, i32
  }
  func.func @transform_5(%arg0: i32, %arg1: i32) -> (i32, i32) {
    %c0_i32 = arith.constant 0 : i32
    return %arg0, %arg1 : i32, i32
  }
}

</mosaic_0001>

<bundles_post_ra>
// kernel: imgnn_forward.1
= control target key start
LH: loop header
LB: loop body
LE: loop exit
PB: predicated region body
PF: predicated region fallthrough
CT: control target
= control target key end

     0   :  { %10 = vsyncpa [#allocation3], 0  ;;  %s945_s0 = inlined_call_operand.vmem [shape: f32[16,512], index: 0, kind: input, shape index: {}]   ;;  %s946_s1 = inlined_call_operand.vmem [shape: f32[1,512], index: 1, kind: input, shape index: {}]   ;;  %s947_s2 = inlined_call_operand.vmem [shape: f32[1,512], index: 2, kind: input, shape index: {}]   ;;  %s948_s3 = inlined_call_operand.hbm [shape: bf16[512,256], index: 3, kind: input, shape index: {}]   ;;  %s949_s4 = inlined_call_operand.vmem [shape: f32[1,256], index: 4, kind: input, shape index: {}]   ;;  %s950_s5 = inlined_call_operand.hbm [shape: f32[16,256], index: 5, kind: output, shape index: {}]  }
   0x1   :  { %11 = vsyncpa [#allocation4], 0  ;;  %s836_s18 = smov [#allocation2]   ;;  %s788_s22 = scalar_lea.hbm %s948_s3, 8192 }
   0x2   :  { %s23_s19 = sshll.u32 %s836_s18, 4  ;;  %p789_p0 = scmp.ne.s32.totalorder %s948_s3, %s788_s22  ;;  %s24_s19 = int_to_ptr.vmem [resolvable:$true] %s23_s19 }
   0x3   :  { %p792_p1 = scmp.lt.u32.totalorder %s788_s22, %s948_s3 }
   0x5   :  { %p794_p2 = pnand %p792_p1, %p789_p0 }
   0x7   :  { %797 = shalt.err (!%p794_p2)
}
   0x8   :  { %s798_s27 = scalar_lea.vmem %s24_s19, 8192  ;;  %p803_p4 = scmp.lt.s32.totalorder %s24_s19, %s24_s19 }
   0x9   :  { %p799_p3 = scmp.ne.s32.totalorder %s24_s19, %s798_s27  ;;  %p804_p5 = scmp.lt.s32.totalorder %s798_s27, %s798_s27 }
   0xb   :  { %p805_p6 = por %p804_p5, %p803_p4 }
   0xd   :  { %p806_p7 = pnand %p805_p6, %p799_p3 }
   0xf   :  { %809 = shalt.err (!%p806_p7)
}
  0x10   :  { %s837_s28 = smov 128   ;;  %s838_s29 = smov 8  }
  0x11   :  { %29 = dma.hbm_to_vmem [thread:$0]  %s948_s3, 8192, %s24_s19, [#allocation3], %s837_s28, %s837_s28, %s838_s29  }
  0x12   :  { %832 = dma.done.wait [#allocation3], 8192  }
  0x13   :  { %833 = vsyncadd [#allocation3], 4294959104  ;;  %v692_v0 = vld [vmem:[#allocation2 + $0x4] ss:$8 sps:$4 sm:$0xff]   ;;  %v696_v2 = vld [vmem:[#allocation2] ss:$8 sps:$4 sm:$0xff]   ;;  %v45_v37 = vlaneseq }
  0x14   :  { %v694_v1 = vld [vmem:[#allocation2 + $0x104] ss:$8 sps:$4 sm:$0xff]   ;;  %503 = vmatprep.subr.bf16.mxu1 %v692_v0  ;;  %v697_v3 = vld [vmem:[#allocation2 + $0x100] ss:$8 sps:$4 sm:$0xff]   ;;  %v698_v4 = vld [vmem:[#allocation2 + $0x14] ss:$8 sps:$4 sm:$0xff]  }
  0x15   :  { %546 = vmatprep.subr.bf16.mxu0 %v694_v1  ;;  %504 = vmatpush1.bf16.msra.mxu1 %v696_v2  ;;  %v700_v5 = vld [vmem:[#allocation2 + $0x114] ss:$8 sps:$4 sm:$0xff]   ;;  %v702_v6 = vld [vmem:[#allocation2 + $0x10] ss:$8 sps:$4 sm:$0xff]   ;;  %v704_v8 = vld [vmem:[#allocation2 + $0x24] ss:$8 sps:$4 sm:$0xff]  }
  0x16   :  { %547 = vmatpush1.bf16.msra.mxu0 %v697_v3  ;;  %505 = vmatprep.subr.bf16.mxu1 %v698_v4  ;;  %v703_v7 = vld [vmem:[#allocation2 + $0x110] ss:$8 sps:$4 sm:$0xff]   ;;  %v706_v9 = vld [vmem:[#allocation2 + $0x124] ss:$8 sps:$4 sm:$0xff]   ;;  %v708_v10 = vld [vmem:[#allocation2 + $0x20] ss:$8 sps:$4 sm:$0xff]  }
  0x17   :  { %548 = vmatprep.subr.bf16.mxu0 %v700_v5  ;;  %v709_v11 = vld [vmem:[#allocation2 + $0x120] ss:$8 sps:$4 sm:$0xff]   ;;  %v710_v12 = vld [vmem:[#allocation2 + $0x34] ss:$8 sps:$4 sm:$0xff]   ;;  %v714_v14 = vld [vmem:[#allocation2 + $0x30] ss:$8 sps:$4 sm:$0xff]  }
  0x18   :  { %v712_v13 = vld [vmem:[#allocation2 + $0x134] ss:$8 sps:$4 sm:$0xff]   ;;  %v715_v15 = vld [vmem:[#allocation2 + $0x130] ss:$8 sps:$4 sm:$0xff]   ;;  %v716_v16 = vld [vmem:[#allocation2 + $0x44] ss:$8 sps:$4 sm:$0xff]  }
  0x19   :  { %506 = vmatpush1.bf16.msra.mxu1 %v702_v6  ;;  %v718_v17 = vld [vmem:[#allocation2 + $0x144] ss:$8 sps:$4 sm:$0xff]   ;;  %v720_v18 = vld [vmem:[#allocation2 + $0x40] ss:$8 sps:$4 sm:$0xff]   ;;  %v722_v20 = vld [vmem:[#allocation2 + $0x54] ss:$8 sps:$4 sm:$0xff]  }
  0x1a   :  { %549 = vmatpush1.bf16.msra.mxu0 %v703_v7  ;;  %507 = vmatprep.subr.bf16.mxu1 %v704_v8  ;;  %v721_v19 = vld [vmem:[#allocation2 + $0x140] ss:$8 sps:$4 sm:$0xff]   ;;  %v724_v21 = vld [vmem:[#allocation2 + $0x154] ss:$8 sps:$4 sm:$0xff]   ;;  %v726_v22 = vld [vmem:[#allocation2 + $0x50] ss:$8 sps:$4 sm:$0xff]  }
  0x1b   :  { %550 = vmatprep.subr.bf16.mxu0 %v706_v9  ;;  %v727_v23 = vld [vmem:[#allocation2 + $0x150] ss:$8 sps:$4 sm:$0xff]   ;;  %v728_v24 = vld [vmem:[#allocation2 + $0x64] ss:$8 sps:$4 sm:$0xff]   ;;  %v732_v26 = vld [vmem:[#allocation2 + $0x60] ss:$8 sps:$4 sm:$0xff]  }
  0x1c   :  { %v730_v25 = vld [vmem:[#allocation2 + $0x164] ss:$8 sps:$4 sm:$0xff]   ;;  %v733_v27 = vld [vmem:[#allocation2 + $0x160] ss:$8 sps:$4 sm:$0xff]   ;;  %v734_v28 = vld [vmem:[#allocation2 + $0x74] ss:$8 sps:$4 sm:$0xff]  }
  0x1d   :  { %508 = vmatpush1.bf16.msra.mxu1 %v708_v10  ;;  %v736_v29 = vld [vmem:[#allocation2 + $0x174] ss:$8 sps:$4 sm:$0xff]   ;;  %v738_v30 = vld [vmem:[#allocation2 + $0x70] ss:$8 sps:$4 sm:$0xff]   ;;  %v740_v32 = vld [vmem:[#allocation2 + $0x84] ss:$8 sps:$4 sm:$0xff]  }
  0x1e   :  { %551 = vmatpush1.bf16.msra.mxu0 %v709_v11  ;;  %509 = vmatprep.subr.bf16.mxu1 %v710_v12  ;;  %v739_v31 = vld [vmem:[#allocation2 + $0x170] ss:$8 sps:$4 sm:$0xff]   ;;  %v742_v33 = vld [vmem:[#allocation2 + $0x184] ss:$8 sps:$4 sm:$0xff]   ;;  %v744_v34 = vld [vmem:[#allocation2 + $0x80] ss:$8 sps:$4 sm:$0xff]  }
  0x1f   :  { %552 = vmatprep.subr.bf16.mxu0 %v712_v13  ;;  %v745_v35 = vld [vmem:[#allocation2 + $0x180] ss:$8 sps:$4 sm:$0xff]   ;;  %v746_v36 = vld [vmem:[#allocation2 + $0x94] ss:$8 sps:$4 sm:$0xff]   ;;  %v750_v39 = vld [vmem:[#allocation2 + $0x90] ss:$8 sps:$4 sm:$0xff]  }
  0x20   :  { %v748_v38 = vld [vmem:[#allocation2 + $0x194] ss:$8 sps:$4 sm:$0xff]   ;;  %v751_v40 = vld [vmem:[#allocation2 + $0x190] ss:$8 sps:$4 sm:$0xff]   ;;  %v752_v41 = vld [vmem:[#allocation2 + $0xa4] ss:$8 sps:$4 sm:$0xff]  }
  0x21   :  { %510 = vmatpush1.bf16.msra.mxu1 %v714_v14  ;;  %v884_v42 = vshrl.u32 %v45_v37, 7  ;;  %v754_v43 = vld [vmem:[#allocation2 + $0x1a4] ss:$8 sps:$4 sm:$0xff]   ;;  %v756_v44 = vld [vmem:[#allocation2 + $0xa0] ss:$8 sps:$4 sm:$0xff]   ;;  %v38_v58 = vld [vmem:[%s945_s0 + $0x18] sm:$0xff] }
  0x22   :  { %553 = vmatpush1.bf16.msra.mxu0 %v715_v15  ;;  %511 = vmatprep.subr.bf16.mxu1 %v716_v16  ;;  %v757_v45 = vld [vmem:[#allocation2 + $0x1a0] ss:$8 sps:$4 sm:$0xff]   ;;  %v758_v46 = vld [vmem:[#allocation2 + $0xb4] ss:$8 sps:$4 sm:$0xff]   ;;  %v762_v50 = vld [vmem:[#allocation2 + $0xb0] ss:$8 sps:$4 sm:$0xff]  }
  0x23   :  { %554 = vmatprep.subr.bf16.mxu0 %v718_v17  ;;  %v887_v47 = vsub.s32 1, %v884_v42  ;;  %v59_v48 = vsub.s32 3, %v884_v42  ;;  %v760_v49 = vld [vmem:[#allocation2 + $0x1b4] ss:$8 sps:$4 sm:$0xff]   ;;  %v36_v51 = vld [vmem:[%s945_s0 + $0x8] sm:$0xff]  ;;  %v911_v0 = vsub.s32 0, %v884_v42 }
  0x24   :  { %v40_v52 = vld [vmem:[%s945_s0 + $0x28] sm:$0xff]  ;;  %v43_v53 = vld [vmem:[%s946_s1] sm:$0xf]  ;;  %v763_v55 = vld [vmem:[#allocation2 + $0x1b0] ss:$8 sps:$4 sm:$0xff]   ;;  %v55_v5 = vsub.s32 2, %v884_v42 }
  0x25   :  { %512 = vmatpush1.bf16.msra.mxu1 %v720_v18  ;;  %v73_v54 = vld [vmem:[%s947_s2] sm:$0xf]  ;;  %v52_v56 = vrot.slane %v43_v53, %v887_v47  ;;  %v42_v59 = vld [vmem:[%s945_s0 + $0x38] sm:$0xff]  ;;  %v60_v60 = vrot.slane %v43_v53, %v59_v48  ;;  %v764_v61 = vld [vmem:[#allocation2 + $0xc4] ss:$8 sps:$4 sm:$0xff]   ;;  %v48_v15 = vrot.slane %v43_v53, %v911_v0  ;;  %s839_s25 = smov [#allocation5]  }
  0x26   :  { %555 = vmatpush1.bf16.msra.mxu0 %v721_v19  ;;  %513 = vmatprep.subr.bf16.mxu1 %v722_v20  ;;  %v82_v57 = vrot.slane %v73_v54, %v887_v47  ;;  %v766_v62 = vld [vmem:[#allocation2 + $0x1c4] ss:$8 sps:$4 sm:$0xff]   ;;  %v90_v63 = vrot.slane %v73_v54, %v59_v48  ;;  %v768_v6 = vld [vmem:[#allocation2 + $0xc0] ss:$8 sps:$4 sm:$0xff]   ;;  %v770_v11 = vld [vmem:[#allocation2 + $0xd4] ss:$8 sps:$4 sm:$0xff]   ;;  %v56_v20 = vrot.slane %v43_v53, %v55_v5 }
  0x27   :  { %556 = vmatprep.subr.bf16.mxu0 %v724_v21  ;;  %v66_v1 = vmul.f32 %v52_v56, %v36_v51  ;;  %v70_v2 = vmul.f32 %v52_v56, %v40_v52  ;;  %v68_v3 = vmul.f32 %v60_v60, %v38_v58  ;;  %v72_v4 = vmul.f32 %v60_v60, %v42_v59  ;;  %v769_v7 = vld [vmem:[#allocation2 + $0x1c0] ss:$8 sps:$4 sm:$0xff]   ;;  %v772_v12 = vld [vmem:[#allocation2 + $0x1d4] ss:$8 sps:$4 sm:$0xff]   ;;  %v774_v16 = vld [vmem:[#allocation2 + $0xd0] ss:$8 sps:$4 sm:$0xff]  }
  0x28   :  { %v775_v17 = vld [vmem:[#allocation2 + $0x1d0] ss:$8 sps:$4 sm:$0xff]   ;;  %v35_v19 = vld [vmem:[%s945_s0] sm:$0xff] }
  0x29   :  { %514 = vmatpush1.bf16.msra.mxu1 %v726_v22  ;;  %v96_v8 = vadd.f32 %v82_v57, %v66_v1  ;;  %v100_v9 = vadd.f32 %v82_v57, %v70_v2  ;;  %v98_v10 = vadd.f32 %v90_v63, %v68_v3  ;;  %v102_v13 = vadd.f32 %v90_v63, %v72_v4  ;;  %v39_v21 = vld [vmem:[%s945_s0 + $0x20] sm:$0xff]  ;;  %v37_v22 = vld [vmem:[%s945_s0 + $0x10] sm:$0xff] }
  0x2a   :  { %557 = vmatpush1.bf16.msra.mxu0 %v727_v23  ;;  %515 = vmatprep.subr.bf16.mxu1 %v728_v24  ;;  %v41_v23 = vld [vmem:[%s945_s0 + $0x30] sm:$0xff]  ;;  %v776_v24 = vld [vmem:[#allocation2 + $0xe4] ss:$8 sps:$4 sm:$0xff]  }
  0x2b   :  { %558 = vmatprep.subr.bf16.mxu0 %v730_v25  ;;  %v104_v14 = vpack.c.bf16 %v100_v9, %v96_v8  ;;  %v106_v18 = vpack.c.bf16 %v102_v13, %v98_v10  ;;  %v778_v25 = vld [vmem:[#allocation2 + $0x1e4] ss:$8 sps:$4 sm:$0xff]  }
  0x2d   :  { %516 = vmatpush1.bf16.msra.mxu1 %v732_v26  ;;  %535 = vmatprep.mubr.bf16.mxu1 %v104_v14  ;;  %v65_v26 = vmul.f32 %v48_v15, %v35_v19 }
  0x2e   :  { %559 = vmatpush1.bf16.msra.mxu0 %v733_v27  ;;  %517 = vmatprep.subr.bf16.mxu1 %v734_v28  ;;  %v78_v27 = vrot.slane %v73_v54, %v911_v0  ;;  %v69_v28 = vmul.f32 %v48_v15, %v39_v21 }
  0x2f   :  { %560 = vmatprep.subr.bf16.mxu0 %v736_v29  ;;  %578 = vmatprep.mubr.bf16.mxu0 %v106_v18  ;;  %v67_v29 = vmul.f32 %v56_v20, %v37_v22 }
  0x30   :  { %v99_v37 = vadd.f32 %v78_v27, %v69_v28 }
  0x31   :  { %518 = vmatpush1.bf16.msra.mxu1 %v738_v30  ;;  %v71_v30 = vmul.f32 %v56_v20, %v41_v23 }
  0x32   :  { %561 = vmatpush1.bf16.msra.mxu0 %v739_v31  ;;  %519 = vmatprep.subr.bf16.mxu1 %v740_v32  ;;  %v86_v31 = vrot.slane %v73_v54, %v55_v5  ;;  %v780_v32 = vld [vmem:[#allocation2 + $0xe0] ss:$8 sps:$4 sm:$0xff]  }
  0x33   :  { %562 = vmatprep.subr.bf16.mxu0 %v742_v33  ;;  %v781_v33 = vld [vmem:[#allocation2 + $0x1e0] ss:$8 sps:$4 sm:$0xff]  }
  0x35   :  { %520 = vmatpush1.bf16.msra.mxu1 %v744_v34  ;;  %v782_v34 = vld [vmem:[#allocation2 + $0xf4] ss:$8 sps:$4 sm:$0xff]  }
  0x36   :  { %563 = vmatpush1.bf16.msra.mxu0 %v745_v35  ;;  %521 = vmatprep.subr.bf16.mxu1 %v746_v36  ;;  %v784_v35 = vld [vmem:[#allocation2 + $0x1f4] ss:$8 sps:$4 sm:$0xff]   ;;  %v95_v36 = vadd.f32 %v78_v27, %v65_v26 }
  0x37   :  { %564 = vmatprep.subr.bf16.mxu0 %v748_v38  ;;  %v97_v38 = vadd.f32 %v86_v31, %v67_v29 }
  0x38   :  { %v103_v42 = vpack.c.bf16 %v99_v37, %v95_v36 }
  0x39   :  { %522 = vmatpush1.bf16.msra.mxu1 %v750_v39  ;;  %v101_v39 = vadd.f32 %v86_v31, %v71_v30 }
  0x3a   :  { %565 = vmatpush1.bf16.msra.mxu0 %v751_v40  ;;  %523 = vmatprep.subr.bf16.mxu1 %v752_v41  ;;  %v786_v40 = vld [vmem:[#allocation2 + $0xf0] ss:$8 sps:$4 sm:$0xff]  }
  0x3b   :  { %566 = vmatprep.subr.bf16.mxu0 %v754_v43  ;;  %v787_v41 = vld [vmem:[#allocation2 + $0x1f0] ss:$8 sps:$4 sm:$0xff]   ;;  %v105_v43 = vpack.c.bf16 %v101_v39, %v97_v38 }
  0x3d   :  { %524 = vmatpush1.bf16.msra.mxu1 %v756_v44  ;;  %v171_v44 = vld [vmem:[%s949_s4] sm:$0x3]  ;;  %s602_s4 = sshll.u32 %s839_s25, 4  ;;  %s603_s4 = int_to_ptr.vmem [resolvable:$true] %s602_s4 }
  0x3e   :  { %567 = vmatpush1.bf16.msra.mxu0 %v757_v45  ;;  %525 = vmatprep.subr.bf16.mxu1 %v758_v46  ;;  %v176_v45 = vrot.slane %v171_v44, %v911_v0  ;;  %v180_v46 = vrot.slane %v171_v44, %v887_v47  ;;  %s810_s26 = scalar_lea.vmem %s603_s4, 512  ;;  %p815_p9 = scmp.lt.s32.totalorder %s603_s4, %s603_s4 }
  0x3f   :  { %568 = vmatprep.subr.bf16.mxu0 %v760_v49  ;;  %p811_p8 = scmp.ne.s32.totalorder %s603_s4, %s810_s26  ;;  %p816_p10 = scmp.lt.s32.totalorder %s810_s26, %s810_s26 }
  0x41   :  { %526 = vmatpush1.bf16.msra.mxu1 %v762_v50  ;;  %p817_p11 = por %p816_p10, %p815_p9 }
  0x42   :  { %569 = vmatpush1.bf16.msra.mxu0 %v763_v55  ;;  %527 = vmatprep.subr.bf16.mxu1 %v764_v61 }
  0x43   :  { %570 = vmatprep.subr.bf16.mxu0 %v766_v62  ;;  %p818_p12 = pnand %p817_p11, %p811_p8 }
  0x45   :  { %528 = vmatpush1.bf16.msra.mxu1 %v768_v6 }
  0x46   :  { %571 = vmatpush1.bf16.msra.mxu0 %v769_v7  ;;  %529 = vmatprep.subr.bf16.mxu1 %v770_v11 }
  0x47   :  { %572 = vmatprep.subr.bf16.mxu0 %v772_v12 }
  0x49   :  { %530 = vmatpush1.bf16.msra.mxu1 %v774_v16 }
  0x4a   :  { %573 = vmatpush1.bf16.msra.mxu0 %v775_v17  ;;  %531 = vmatprep.subr.bf16.mxu1 %v776_v24 }
  0x4b   :  { %574 = vmatprep.subr.bf16.mxu0 %v778_v25 }
  0x4d   :  { %532 = vmatpush1.bf16.msra.mxu1 %v780_v32 }
  0x4e   :  { %575 = vmatpush1.bf16.msra.mxu0 %v781_v33  ;;  %533 = vmatprep.subr.bf16.mxu1 %v782_v34 }
  0x4f   :  { %576 = vmatprep.subr.bf16.mxu0 %v784_v35 }
  0x51   :  { %534 = vmatpush1.bf16.msra.mxu1 %v786_v40 }
  0x52   :  { %577 = vmatpush1.bf16.msra.mxu0 %v787_v41 }
  0x54   :  { %536 = vmatmul.mubr.bf16.vlgmr.msra.gmra.mrb[0].mxu1 %v103_v42 }
  0x55   :  { %579 = vmatmul.mubr.bf16.vlgmr.msra.gmra.mrb[0].mxu0 %v105_v43 }
 0x127   :  { %v537_v48 = vpop.f32.mrb[0].mxu1 }
 0x128   :  { %v580_v49 = vpop.f32.mrb[0].mxu0  ;;  %v538_v50 = vadd.f32 %v537_v48, %v176_v45  ;;  %v539_v51 = vpop.f32.mrb[1].mxu1 }
 0x129   :  { %v582_v52 = vpop.f32.mrb[1].mxu0  ;;  %v540_v53 = vadd.f32 %v539_v51, %v180_v46  ;;  %v541_v54 = vpop.f32.mrb[2].mxu1 }
 0x12a   :  { %v584_v55 = vpop.f32.mrb[2].mxu0  ;;  %v581_v56 = vadd.f32 %v580_v49, %v538_v50  ;;  %v542_v57 = vadd.f32 %v541_v54, %v176_v45  ;;  %v543_v58 = vpop.f32.mrb[3].mxu1 }
 0x12b   :  { %v586_v59 = vpop.f32.mrb[3].mxu0  ;;  %v583_v60 = vadd.f32 %v582_v52, %v540_v53  ;;  %v544_v61 = vadd.f32 %v543_v58, %v180_v46 }
 0x12c   :  { %v589_v62 = vmax.f32 %v581_v56, 0.0  ;;  %v585_v63 = vadd.f32 %v584_v55, %v542_v57 }
 0x12d   :  { %v590_v0 = vmax.f32 %v583_v60, 0.0  ;;  %v587_v47 = vadd.f32 %v586_v59, %v544_v61 }
 0x12e   :  { %593 = vst [vmem:[#allocation5] sm:$0xff] %v589_v62  ;;  %v591_v1 = vmax.f32 %v585_v63, 0.0 }
 0x12f   :  { %594 = vst [vmem:[#allocation5 + $0x8] sm:$0xff] %v590_v0  ;;  %v592_v2 = vmax.f32 %v587_v47, 0.0 }
 0x130   :  { %595 = vst [vmem:[#allocation5 + $0x10] sm:$0xff] %v591_v1 }
 0x131   :  { %596 = vst [vmem:[#allocation5 + $0x18] sm:$0xff] %v592_v2 }
 0x132   :  { %821 = shalt.err (!%p818_p12)
}
 0x133   :  { %s822_s29 = scalar_lea.hbm %s950_s5, 512 }
 0x134   :  { %p823_p13 = scmp.ne.s32.totalorder %s950_s5, %s822_s29  ;;  %p826_p0 = scmp.lt.u32.totalorder %s822_s29, %s950_s5 }
 0x136   :  { %p828_p1 = pnand %p826_p0, %p823_p13 }
 0x138   :  { %831 = shalt.err (!%p828_p1)
}
 0x139   :  { %s840_s8 = smov 256   ;;  %s841_s9 = smov 16  }
 0x13a   :  { %608 = dma.vmem_to_hbm [thread:$0]  %s603_s4, 512, %s950_s5, [#allocation4], %s840_s8, %s840_s8, %s841_s9  }
 0x13b   :  { %834 = dma.done.wait [#allocation4], 512  }
 0x13c   :  { %835 = vsyncadd [#allocation4], 4294966784 }
 0x13d   :  { %612 = vsyncpa [#allocation3], 1 }
 0x13e   :  { %613 = vsyncpa [#allocation4], 1 }

</bundles_post_ra>
